<compile_context>
chip_gen: v5e
topology: v5e:2x2
jax: 0.10.0
libtpu: 0.0.40
codegen_flags: <defaults>
</compile_context>

<pallas_src>
import jax
import jax.numpy as jnp
from jax import lax
from jax.experimental import pallas as pl
from jax.experimental.pallas import tpu as pltpu

PAD_INDEX = 0
UNK_INDEX = 1
SOS_INDEX = 2
EOS_INDEX = 3
WORD_DROPOUT = 0.25          # probability of replacing a token with UNK
KEEP_PROB = 1.0 - WORD_DROPOUT


# ----------------------------------------------------------------------------
# Fused kernel: word dropout + one-hot embedding + output projection
#   Block i covers `bb` consecutive batch rows (bb * S flattened rows).
# ----------------------------------------------------------------------------
def _decoder_kernel(tok_ref, u_ref, table_ref, wout_ref, latb_ref, out_ref):
    _, bb, s = tok_ref.shape            # (1, BB, S)
    v = wout_ref.shape[1]               # vocab size

    # --- word dropout (single select chain, no int multiplies) -------------
    tok = tok_ref[0]                    # (BB, S) int32
    u = u_ref[0]                        # (BB, S) f32 uniforms in [0, 1)
    keep = u < KEEP_PROB                # bernoulli(1 - word_dropout)
    dropped = jnp.where(keep, tok, UNK_INDEX)
    special = (tok == PAD_INDEX) | (tok == SOS_INDEX) | (tok == EOS_INDEX)
    masked = jnp.where(special, tok, dropped)          # (BB, S) int32

    # --- embedding gather as a one-hot MXU matmul ---------------------------
    onehot = (masked[:, :, None] ==
              lax.broadcasted_iota(jnp.int32, (bb, s, v), 2)
              ).astype(jnp.bfloat16)                   # (BB, S, V)
    onehot2d = onehot.reshape(bb * s, v)               # (BB*S, V), lane dim kept
    emb = jnp.dot(onehot2d, table_ref[...],
                  preferred_element_type=jnp.float32)  # (BB*S, E) f32

    # --- output projection; latent path + bias folded into latb ------------
    logits = jnp.dot(emb.astype(jnp.bfloat16), wout_ref[...],
                     preferred_element_type=jnp.float32)   # (BB*S, V) f32
    logits = logits.reshape(bb, s, v) + latb_ref[0][:, None, :]
    out_ref[0] = logits


def decoder_forward(latent, trg, params, *, rng_key, train=True,
                    rows_per_tile=256):
    """latent: (B, L) f32, trg: (B, S) int32 -> logits (B, S, V) f32."""
    emb_table, w_lat, w_out, b_out = params
    B, S = trg.shape
    V, E = emb_table.shape

    # Fold the latent projection and the output bias into one per-batch
    # additive term (tiny GEMMs, plain JAX):
    #   (emb + lat@Wl) @ Wo + b  ==  emb@Wo + (lat@Wl@Wo + b)
    lat_bias = latent @ w_lat @ w_out + b_out                    # (B, V) f32

    # Per-token uniforms for word dropout (plain JAX PRNG; the select itself
    # runs inside the fused kernel).  Eval mode keeps every token.
    if train:
        u = jax.random.uniform(rng_key, (B, S), jnp.float32)
    else:
        u = jnp.zeros((B, S), jnp.float32)

    # Row-tiles of the flattened (B*S) dimension: bb consecutive batches per
    # tile so each tile is bb*S rows (target ~256 rows).
    bb = max(1, min(B, rows_per_tile // S))
    while B % bb:
        bb -= 1
    G = B // bb

    tok_r = trg.astype(jnp.int32).reshape(G, bb, S)
    u_r = u.reshape(G, bb, S)
    latb_r = lat_bias.reshape(G, bb, V)
    table_bf16 = emb_table.astype(jnp.bfloat16)
    wout_bf16 = w_out.astype(jnp.bfloat16)

    out = pl.pallas_call(
        _decoder_kernel,
        out_shape=jax.ShapeDtypeStruct((G, bb, S, V), jnp.float32),
        grid=(G,),
        in_specs=[
            pl.BlockSpec((1, bb, S), lambda i: (i, 0, 0)),    # tokens
            pl.BlockSpec((1, bb, S), lambda i: (i, 0, 0)),    # uniforms
            pl.BlockSpec((V, E), lambda i: (0, 0)),           # emb table (bf16)
            pl.BlockSpec((E, V), lambda i: (0, 0)),           # W_out (bf16)
            pl.BlockSpec((1, bb, V), lambda i: (i, 0, 0)),    # folded latent+bias
        ],
        out_specs=pl.BlockSpec((1, bb, S, V), lambda i: (i, 0, 0, 0)),
        compiler_params=pltpu.CompilerParams(
            dimension_semantics=("parallel",)),
    )(tok_r, u_r, table_bf16, wout_bf16, latb_r)

    return out.reshape(B, S, V)


# ----------------------------------------------------------------------------
# Parameter construction (deterministic, in-script)
# ----------------------------------------------------------------------------
def make_params(key, vocab_size, embed_size, latent_size):
    k1, k2, k3 = jax.random.split(key, 3)
    emb_table = jax.random.normal(k1, (vocab_size, embed_size), jnp.float32) * 0.02
    w_lat = jax.random.normal(k2, (latent_size, embed_size), jnp.float32) * 0.02
    w_out = jax.random.normal(k3, (embed_size, vocab_size), jnp.float32) * 0.02
    b_out = jnp.zeros((1, vocab_size), jnp.float32)
    return emb_table, w_lat, w_out, b_out


if __name__ == "__main__":
    B, S, L, E, V = 8, 128, 32, 32, 256

    key = jax.random.PRNGKey(0)
    k_lat, k_trg, k_par, k_drop = jax.random.split(key, 4)

    latent = jax.random.normal(k_lat, (B, L), jnp.float32)
    trg = jax.random.randint(k_trg, (B, S), 0, V, dtype=jnp.int32)
    # Sprinkle special tokens so the preserve-path is exercised.
    trg = trg.at[:, 0].set(SOS_INDEX).at[:, -1].set(EOS_INDEX).at[:, -2].set(PAD_INDEX)

    params = make_params(k_par, V, E, L)

    logits = decoder_forward(latent, trg, params, rng_key=k_drop, train=True)
    jax.block_until_ready(logits)

    assert logits.shape == (B, S, V) and logits.dtype == jnp.float32
    print("KERNEL_OK")
</pallas_src>

<mosaic_0001>
module attributes {stable_mosaic.version = 11 : i64} {
  func.func @_decoder_kernel(%arg0: i32, %arg1: memref<1x2x128xi32, #tpu.memory_space<vmem>>, %arg2: memref<1x2x128xf32, #tpu.memory_space<vmem>>, %arg3: memref<256x32xbf16, #tpu.memory_space<vmem>>, %arg4: memref<32x256xbf16, #tpu.memory_space<vmem>>, %arg5: memref<1x2x256xf32, #tpu.memory_space<vmem>>, %arg6: memref<1x2x128x256xf32, #tpu.memory_space<vmem>>) attributes {dimension_semantics = [#tpu.dimension_semantics<parallel>], iteration_bounds = array<i64: 4>, scalar_prefetch = 0 : i64, scratch_operands = 0 : i64, tpu.core_type = #tpu.core_type<tc>, window_params = [{transform_indices = @transform_0, window_bounds = array<i64: 1, 2, 128>}, {transform_indices = @transform_1, window_bounds = array<i64: 1, 2, 128>}, {pipeline_mode = #tpu.pipeline_mode<synchronous>, transform_indices = @transform_2, window_bounds = array<i64: 256, 32>}, {pipeline_mode = #tpu.pipeline_mode<synchronous>, transform_indices = @transform_3, window_bounds = array<i64: 32, 256>}, {transform_indices = @transform_4, window_bounds = array<i64: 1, 2, 256>}, {transform_indices = @transform_5, window_bounds = array<i64: 1, 2, 128, 256>}]} {
    %c0 = arith.constant 0 : index
    %c0_0 = arith.constant 0 : index
    %c0_1 = arith.constant 0 : index
    %0 = vector.load %arg1[%c0, %c0_0, %c0_1] : memref<1x2x128xi32, #tpu.memory_space<vmem>>, vector<1x2x128xi32>
    %1 = vector.shape_cast %0 : vector<1x2x128xi32> to vector<2x128xi32>
    %c0_2 = arith.constant 0 : index
    %c0_3 = arith.constant 0 : index
    %c0_4 = arith.constant 0 : index
    %2 = vector.load %arg2[%c0_2, %c0_3, %c0_4] : memref<1x2x128xf32, #tpu.memory_space<vmem>>, vector<1x2x128xf32>
    %3 = vector.shape_cast %2 : vector<1x2x128xf32> to vector<2x128xf32>
    %cst = arith.constant 7.500000e-01 : f32
    %4 = vector.broadcast %cst : f32 to vector<2x128xf32>
    %5 = arith.cmpf olt, %3, %4 : vector<2x128xf32>
    %c1_i32 = arith.constant 1 : i32
    %6 = vector.broadcast %c1_i32 : i32 to vector<2x128xi32>
    %7 = arith.select %5, %1, %6 : vector<2x128xi1>, vector<2x128xi32>
    %c0_i32 = arith.constant 0 : i32
    %8 = vector.broadcast %c0_i32 : i32 to vector<2x128xi32>
    %9 = arith.cmpi eq, %1, %8 : vector<2x128xi32>
    %c2_i32 = arith.constant 2 : i32
    %10 = vector.broadcast %c2_i32 : i32 to vector<2x128xi32>
    %11 = arith.cmpi eq, %1, %10 : vector<2x128xi32>
    %12 = arith.ori %9, %11 : vector<2x128xi1>
    %c3_i32 = arith.constant 3 : i32
    %13 = vector.broadcast %c3_i32 : i32 to vector<2x128xi32>
    %14 = arith.cmpi eq, %1, %13 : vector<2x128xi32>
    %15 = arith.ori %12, %14 : vector<2x128xi1>
    %16 = arith.select %15, %1, %7 : vector<2x128xi1>, vector<2x128xi32>
    %17 = vector.shape_cast %16 : vector<2x128xi32> to vector<2x128x1xi32>
    %18 = tpu.iota {dimensions = array<i32: 2>} : vector<2x128x256xi32>
    %19 = vector.broadcast %17 : vector<2x128x1xi32> to vector<2x128x256xi32>
    %20 = arith.cmpi eq, %19, %18 : vector<2x128x256xi32>
    %21 = arith.extui %20 : vector<2x128x256xi1> to vector<2x128x256xi32>
    %22 = arith.sitofp %21 : vector<2x128x256xi32> to vector<2x128x256xf32>
    %23 = arith.truncf %22 : vector<2x128x256xf32> to vector<2x128x256xbf16>
    %24 = vector.shape_cast %23 : vector<2x128x256xbf16> to vector<256x256xbf16>
    %c0_5 = arith.constant 0 : index
    %c0_6 = arith.constant 0 : index
    %25 = vector.load %arg3[%c0_5, %c0_6] : memref<256x32xbf16, #tpu.memory_space<vmem>>, vector<256x32xbf16>
    %cst_7 = arith.constant dense<0.000000e+00> : vector<256x32xf32>
    %26 = tpu.matmul %24, %25, %cst_7 {dimension_numbers = #tpu.dot_dimension_numbers<[1], [0], [0], [1], [0, 0, 1, 1], [], []>} : vector<256x256xbf16>, vector<256x32xbf16>, vector<256x32xf32> -> vector<256x32xf32>
    %27 = arith.truncf %26 : vector<256x32xf32> to vector<256x32xbf16>
    %c0_8 = arith.constant 0 : index
    %c0_9 = arith.constant 0 : index
    %28 = vector.load %arg4[%c0_8, %c0_9] : memref<32x256xbf16, #tpu.memory_space<vmem>>, vector<32x256xbf16>
    %cst_10 = arith.constant dense<0.000000e+00> : vector<256x256xf32>
    %29 = tpu.matmul %27, %28, %cst_10 {dimension_numbers = #tpu.dot_dimension_numbers<[1], [0], [0], [1], [0, 0, 1, 1], [], []>} : vector<256x32xbf16>, vector<32x256xbf16>, vector<256x256xf32> -> vector<256x256xf32>
    %30 = vector.shape_cast %29 : vector<256x256xf32> to vector<2x128x256xf32>
    %c0_11 = arith.constant 0 : index
    %c0_12 = arith.constant 0 : index
    %c0_13 = arith.constant 0 : index
    %31 = vector.load %arg5[%c0_11, %c0_12, %c0_13] : memref<1x2x256xf32, #tpu.memory_space<vmem>>, vector<1x2x256xf32>
    %32 = vector.shape_cast %31 : vector<1x2x256xf32> to vector<2x256xf32>
    %33 = vector.shape_cast %32 : vector<2x256xf32> to vector<2x1x256xf32>
    %34 = vector.broadcast %33 : vector<2x1x256xf32> to vector<2x128x256xf32>
    %35 = arith.addf %30, %34 : vector<2x128x256xf32>
    %c0_14 = arith.constant 0 : index
    %c0_15 = arith.constant 0 : index
    %c0_16 = arith.constant 0 : index
    %c0_17 = arith.constant 0 : index
    %36 = vector.load %arg6[%c0_14, %c0_15, %c0_16, %c0_17] : memref<1x2x128x256xf32, #tpu.memory_space<vmem>>, vector<1x2x128x256xf32>
    %37 = vector.shape_cast %36 : vector<1x2x128x256xf32> to vector<2x128x256xf32>
    %38 = vector.shape_cast %35 : vector<2x128x256xf32> to vector<1x2x128x256xf32>
    tpu.vector_store %arg6[%c0_14, %c0_15, %c0_16, %c0_17], %38 {strides = array<i32>} : memref<1x2x128x256xf32, #tpu.memory_space<vmem>>, vector<1x2x128x256xf32>,
    return
  }
  func.func @transform_0(%arg0: i32) -> (i32, i32, i32) {
    %c0_i32 = arith.constant 0 : i32
    %c0_i32_0 = arith.constant 0 : i32
    %c0_i32_1 = arith.constant 0 : i32
    return %arg0, %c0_i32, %c0_i32_0 : i32, i32, i32
  }
  func.func @transform_1(%arg0: i32) -> (i32, i32, i32) {
    %c0_i32 = arith.constant 0 : i32
    %c0_i32_0 = arith.constant 0 : i32
    %c0_i32_1 = arith.constant 0 : i32
    return %arg0, %c0_i32, %c0_i32_0 : i32, i32, i32
  }
  func.func @transform_2(%arg0: i32) -> (i32, i32) {
    %c0_i32 = arith.constant 0 : i32
    %c0_i32_0 = arith.constant 0 : i32
    %c0_i32_1 = arith.constant 0 : i32
    return %c0_i32, %c0_i32_0 : i32, i32
  }
  func.func @transform_3(%arg0: i32) -> (i32, i32) {
    %c0_i32 = arith.constant 0 : i32
    %c0_i32_0 = arith.constant 0 : i32
    %c0_i32_1 = arith.constant 0 : i32
    return %c0_i32, %c0_i32_0 : i32, i32
  }
  func.func @transform_4(%arg0: i32) -> (i32, i32, i32) {
    %c0_i32 = arith.constant 0 : i32
    %c0_i32_0 = arith.constant 0 : i32
    %c0_i32_1 = arith.constant 0 : i32
    return %arg0, %c0_i32, %c0_i32_0 : i32, i32, i32
  }
  func.func @transform_5(%arg0: i32) -> (i32, i32, i32, i32) {
    %c0_i32 = arith.constant 0 : i32
    %c0_i32_0 = arith.constant 0 : i32
    %c0_i32_1 = arith.constant 0 : i32
    %c0_i32_2 = arith.constant 0 : i32
    return %arg0, %c0_i32, %c0_i32_0, %c0_i32_1 : i32, i32, i32, i32
  }
}

</mosaic_0001>

<bundles_post_ra>
// kernel: tpu_custom_call.1
= control target key start
LH: loop header
LB: loop body
LE: loop exit
PB: predicated region body
PF: predicated region fallthrough
CT: control target
= control target key end

     0   :  { %10 = vsyncpa [#allocation3], 0  ;;  %s2670_s0 = inlined_call_operand.vmem [shape: s32[4,2,128], index: 0, kind: input, shape index: {}]   ;;  %s2671_s1 = inlined_call_operand.vmem [shape: f32[4,2,128], index: 1, kind: input, shape index: {}]   ;;  %s2672_s2 = inlined_call_operand.vmem [shape: bf16[256,32], index: 2, kind: input, shape index: {}]   ;;  %s2673_s3 = inlined_call_operand.vmem [shape: bf16[32,256], index: 3, kind: input, shape index: {}]   ;;  %s2674_s4 = inlined_call_operand.vmem [shape: f32[4,2,256], index: 4, kind: input, shape index: {}]   ;;  %s2675_s5 = inlined_call_operand.hbm [shape: f32[4,2,128,256], index: 5, kind: output, shape index: {}]  }
   0x1   :  { %12 = vsyncpa [#allocation3 + $0x1], 0  ;;  %s2062_s18 = smov 0   ;;  %s2064_s19 = smov 0  }
   0x2   :  { %s2066_s20 = smov 0   ;;  %s2068_s21 = smov 0  }
   0x3 LB: > { %s2083_s22 = sadd.s32 4294967295, %s2027_s21   ;;  %s1678_s23 = sadd.s32 4294967294, %s2027_s21   ;;  %s2027_s21 = sphi %s2068_s21, %s2681_s21   ;;  %s2023_s20 = sphi %s2066_s20, %s2680_s20   ;;  %s2019_s19 = sphi %s2064_s19, %s2679_s19   ;;  %s2015_s18 = sphi %s2062_s18, %s2678_s18  }
   0x4   : > { %s2087_s24 = sadd.s32 1, %s2027_s21   ;;  %s145_s25 = sadd.s32 1, %s2023_s20 }
   0x5   : > { %s142_s26 = ssub.s32 %s2027_s21, %s2087_s24  ;;  %p155_p0 = scmp.ne.s32.totalorder %s2023_s20, %s2019_s19 }
   0x6   : > { %p143_p1 = scmp.eq.s32.totalorder %s142_s26, 0  ;;  %p156_p2 = scmp.eq.s32.totalorder %s2083_s22, 3 }
   0x7   : > { %p161_p3 = scmp.ne.s32.totalorder %s2019_s19, %s2015_s18  ;;  %p162_p4 = scmp.eq.s32.totalorder %s1678_s23, 3 }
   0x8   : > { %s2098_s27 = scalar_select %p143_p1, %s2023_s20, %s145_s25  }
   0x9   : > { %p2100_p5 = por %p156_p2, %p155_p0  ;;  %p2104_p6 = por %p162_p4, %p161_p3 }
   0xa   : > { %p1681_p7 = scmp.ge.s32.totalorder %s2027_s21, 1  ;;  %p208_p8 = scmp.lt.s32.totalorder %s2027_s21, 5 }
   0xc   : > { %p209_p9 = pnand %p1681_p7, %p208_p8 }
   0xd   : > { %p244_p10 = scmp.lt.s32.totalorder (!%p209_p9), %s2083_s22, 3  ;;  %s1889_s7 = sshll.u32 (!%p209_p9), %s2083_s22, 9 }
   0xe   : > { %212 = sbr.rel (%p209_p9) target bundleno = 696 (0x2b8), region = 40  ;;  %s1588_s10 = scalar_lea.hbm (!%p209_p9), %s2675_s5, %s1889_s7 }
   0xf   : > { %s1985_s17 = scalar_lea.hbm (!%p209_p9), %s2675_s5, 2048 }
  0x13   : > { %v269_v0 = vlaneseq  ;;  %s2115_s30 = scalar_select %p244_p10, %s2083_s22, 3  ;;  %v1876_v15 = vld [vmem:[%s2672_s2 + $0x38] sm:$0xff]  ;;  %v1875_v17 = vld [vmem:[%s2672_s2 + $0x30] sm:$0xff]  ;;  %v1874_v23 = vld [vmem:[%s2672_s2 + $0x28] sm:$0xff]  ;;  %v2029_v43 = vmov 0.0  }
  0x14   : > { %v1884_v16 = vld [vmem:[%s2672_s2 + $0x78] sm:$0xff]  ;;  %977 = vmatpush.bf16.msra.mxu0 %v1876_v15  ;;  %v1883_v18 = vld [vmem:[%s2672_s2 + $0x70] sm:$0xff]  ;;  %v1882_v24 = vld [vmem:[%s2672_s2 + $0x68] sm:$0xff] }
  0x15   : > { %v2112_v1 = vshrl.u32 %v269_v0, 7  ;;  %s1683_s6 = sshll.u32 %s2115_s30, 1  ;;  %1066 = vmatpush.bf16.msra.mxu1 %v1884_v16  ;;  %v1873_v25 = vld [vmem:[%s2672_s2 + $0x20] sm:$0xff]  ;;  %v1872_v29 = vld [vmem:[%s2672_s2 + $0x18] sm:$0xff]  ;;  %v1871_v31 = vld [vmem:[%s2672_s2 + $0x10] sm:$0xff]  ;;  %v2254_v39 = vand.u32 127, %v269_v0 }
  0x16   : > { %s247_s9 = scalar_lea.vmem %s2670_s0, %s1683_s6  ;;  %s251_s12 = scalar_lea.vmem %s2671_s1, %s1683_s6  ;;  %v1881_v26 = vld [vmem:[%s2672_s2 + $0x60] sm:$0xff]  ;;  %v1880_v30 = vld [vmem:[%s2672_s2 + $0x58] sm:$0xff]  ;;  %v1879_v32 = vld [vmem:[%s2672_s2 + $0x50] sm:$0xff] }
  0x17   : > { %1932 = vset.pattern.permute.xlu0 %v2112_v1  ;;  %v283_v2 = vadd.s32 16, %v2112_v1  ;;  %v2121_v3 = vadd.s32 32, %v2112_v1  ;;  %v258_v4 = vld [vmem:[%s247_s9] sm:$0x3]  ;;  %v2139_v9 = vadd.s32 8, %v2112_v1  ;;  %v2142_v10 = vadd.s32 24, %v2112_v1 }
  0x18   : > { %v259_v5 = vld [vmem:[%s251_s12] sm:$0x3]  ;;  %vm262_vm1 = vcmp.eq.s32.totalorder %v258_v4, 0  ;;  %vm263_vm2 = vcmp.eq.s32.totalorder %v258_v4, 2  ;;  %vm265_vm3 = vcmp.eq.s32.totalorder %v258_v4, 3  ;;  %v2145_v11 = vadd.s32 40, %v2112_v1  ;;  %978 = vmatpush.bf16.msra.mxu0 %v1875_v17 }
  0x19   : > { %1934 = vset.pattern.permute.xlu1 %v283_v2  ;;  %1936 = vset.pattern.permute.xlu2 %v2121_v3  ;;  %vm260_vm0 = vcmp.lt.f32.partialorder %v259_v5, 0.75  ;;  %vm264_vm4 = vmor %vm262_vm1, %vm263_vm2  ;;  %v2154_v12 = vadd.s32 64, %v2112_v1  ;;  %v2157_v13 = vadd.s32 48, %v2112_v1  ;;  %v2160_v14 = vadd.s32 56, %v2112_v1  ;;  %v1870_v33 = vld [vmem:[%s2672_s2 + $0x8] sm:$0xff]  ;;  %v1869_v35 = vld [vmem:[%s2672_s2] sm:$0xff] }
  0x1a   : > { %v261_v6 = vsel %vm260_vm0, %v258_v4, 1  ;;  %vm266_vm5 = vmor %vm264_vm4, %vm265_vm3  ;;  %v2181_v19 = vadd.s32 104, %v2112_v1  ;;  %v2184_v20 = vadd.s32 72, %v2112_v1  ;;  %v2187_v21 = vadd.s32 80, %v2112_v1  ;;  %1067 = vmatpush.bf16.msra.mxu1 %v1883_v18  ;;  %v1878_v34 = vld [vmem:[%s2672_s2 + $0x48] sm:$0xff]  ;;  %v1877_v36 = vld [vmem:[%s2672_s2 + $0x40] sm:$0xff] }
  0x1b   : > { %v2130_v7 = vsel %vm266_vm5, %v258_v4, %v261_v6  ;;  %v2196_v22 = vadd.s32 88, %v2112_v1  ;;  %v2213_v27 = vadd.s32 112, %v2112_v1  ;;  %v343_v28 = vadd.s32 96, %v2112_v1  ;;  %s1868_s16 = sshll.u32 %s2115_s30, 2  ;;  %s241_s30 = sand.u32 1, %s2019_s19  }
  0x1c   : > { %v2133_v8 = vperm.slane %v2130_v7, 0  ;;  %979 = vmatpush.bf16.msra.mxu0 %v1874_v23  ;;  %v2245_v37 = vadd.s32 120, %v2112_v1  ;;  %v2248_v38 = vperm.slane %v2130_v7, 1  ;;  %v2260_v40 = vadd.s32 128, %v2254_v39  ;;  %s256_s25 = scalar_lea.vmem %s2674_s4, %s1868_s16  ;;  %s1682_s26 = sshll.u32 %s241_s30, 9 }
  0x1d   : > { %s2483_s6 = scalar_lea.vmem [#allocation2], %s1682_s26  ;;  %s1591_s12 = sshll.u32 %s1588_s10, 4  ;;  %s1592_s12 = int_to_ptr.hbm [resolvable:$true] %s1591_s12 }
  0x1e   : > { %1068 = vmatpush.bf16.msra.mxu1 %v1882_v24  ;;  %s1589_s11 = sshll.u32 %s2483_s6, 4  ;;  %s1577_s22 = scalar_lea.sflag [#allocation3], %s241_s30  ;;  %s1590_s11 = int_to_ptr.vmem [resolvable:$true] %s1589_s11 }
  0x1f   : > { %273 = vperm.xlu0 %1932, %v2133_v8   ;;  %s1979_s13 = sshra.s32 %s1592_s12, 4  ;;  %s1980_s13 = int_to_ptr.hbm [resolvable:$true] %s1979_s13 }
  0x20   : > { %980 = vmatpush.bf16.msra.mxu0 %v1873_v25  ;;  %s1981_s14 = scalar_lea.hbm %s1980_s13, 512  ;;  %p1986_p0 = scmp.lt.s32.totalorder %s1980_s13, %s2675_s5 }
  0x21   : > { %285 = vperm.xlu1 %1934, %v2133_v8   ;;  %297 = vperm.xlu2 %1936, %v2133_v8   ;;  %p1982_p11 = scmp.ne.s32.totalorder %s1980_s13, %s1981_s14  ;;  %p1987_p1 = scmp.lt.s32.totalorder %s1985_s17, %s1981_s14 }
  0x22   : > { %1069 = vmatpush.bf16.msra.mxu1 %v1881_v26 }
  0x23   : > { %p1983_p12 = pnand %p1982_p11, %p2100_p5  ;;  %p1988_p2 = por %p1987_p1, %p1986_p0 }
  0x24   : > { %981 = vmatpush.bf16.msra.mxu0 %v1872_v29 }
  0x25   : > { %p1984_p13 = pneg %p1983_p12 }
  0x26   : > { %1070 = vmatpush.bf16.msra.mxu1 %v1880_v30 }
  0x27   : > { %1933 = vset.pattern.permute.xlu0 %v2139_v9  ;;  %p1989_p3 = pnand %p1988_p2, %p1984_p13 }
  0x28   : > { %982 = vmatpush.bf16.msra.mxu0 %v1871_v31 }
  0x29   : > { %1935 = vset.pattern.permute.xlu1 %v2142_v10  ;;  %1937 = vset.pattern.permute.xlu2 %v2145_v11 }
  0x2a   : > { %1071 = vmatpush.bf16.msra.mxu1 %v1879_v32 }
  0x2c   : > { %983 = vmatpush.bf16.msra.mxu0 %v1870_v33 }
  0x2e   : > { %1072 = vmatpush.bf16.msra.mxu1 %v1878_v34 }
  0x2f   : > { %279 = vperm.xlu0 %1933, %v2133_v8  }
  0x30   : > { %984 = vmatpush.bf16.msra.mxu0 %v1869_v35 }
  0x31   : > { %291 = vperm.xlu1 %1935, %v2133_v8   ;;  %303 = vperm.xlu2 %1937, %v2133_v8  }
  0x32   : > { %1073 = vmatpush.bf16.msra.mxu1 %v1877_v36 }
  0x37   : > { %1940 = vset.pattern.permute.xlu0 %v2154_v12 }
  0x39   : > { %1938 = vset.pattern.permute.xlu1 %v2157_v13  ;;  %1939 = vset.pattern.permute.xlu2 %v2160_v14 }
  0x3f   : > { %321 = vperm.xlu0 %1940, %v2133_v8  }
  0x41   : > { %309 = vperm.xlu1 %1938, %v2133_v8   ;;  %315 = vperm.xlu2 %1939, %v2133_v8  }
  0x47   : > { %1945 = vset.pattern.permute.xlu0 %v2181_v19 }
  0x49   : > { %1941 = vset.pattern.permute.xlu1 %v2184_v20  ;;  %1942 = vset.pattern.permute.xlu2 %v2187_v21 }
  0x4f   : > { %351 = vperm.xlu0 %1945, %v2133_v8  }
  0x51   : > { %327 = vperm.xlu1 %1941, %v2133_v8   ;;  %333 = vperm.xlu2 %1942, %v2133_v8  }
  0x57   : > { %1950 = vset.pattern.permute.xlu0 %v283_v2 }
  0x59   : > { %1943 = vset.pattern.permute.xlu1 %v2196_v22  ;;  %1944 = vset.pattern.permute.xlu2 %v343_v28 }
  0x5f   : > { %382 = vperm.xlu0 %1950, %v2248_v38  }
  0x61   : > { %339 = vperm.xlu1 %1943, %v2133_v8   ;;  %345 = vperm.xlu2 %1944, %v2133_v8  }
  0x67   : > { %1955 = vset.pattern.permute.xlu0 %v2160_v14 }
  0x69   : > { %1946 = vset.pattern.permute.xlu1 %v2213_v27  ;;  %1947 = vset.pattern.permute.xlu2 %v2245_v37 }
  0x6f   : > { %412 = vperm.xlu0 %1955, %v2248_v38  }
  0x71   : > { %357 = vperm.xlu1 %1946, %v2133_v8   ;;  %363 = vperm.xlu2 %1947, %v2133_v8  }
  0x77   : > { %1960 = vset.pattern.permute.xlu0 %v343_v28 }
  0x79   : > { %1948 = vset.pattern.permute.xlu1 %v2112_v1  ;;  %1949 = vset.pattern.permute.xlu2 %v2139_v9 }
  0x7b   : > { %v298_v58 = vpop.permute.xlu2 %297 }
  0x7c   : > { %vm473_vm14 = vcmp.eq.s32.totalorder %v298_v58, %v2254_v39  ;;  %vm474_vm15 = vcmp.eq.s32.totalorder %v298_v58, %v2260_v40 }
  0x7d   : > { %v1695_v8 = vsel %vm473_vm14, 1.0, %v2029_v43  ;;  %v1696_v9 = vsel %vm474_vm15, 1.0, %v2029_v43 }
  0x7f   : > { %442 = vperm.xlu0 %1960, %v2248_v38  }
  0x81   : > { %370 = vperm.xlu1 %1948, %v2248_v38   ;;  %376 = vperm.xlu2 %1949, %v2248_v38  }
  0x87   : > { %1964 = vset.pattern.permute.xlu0 %v2245_v37 }
  0x89   : > { %1951 = vset.pattern.permute.xlu1 %v2142_v10  ;;  %1952 = vset.pattern.permute.xlu2 %v2121_v3 }
  0x8b   : > { %v304_v3 = vpop.permute.xlu2 %303 }
  0x8c   : > { %vm475_vm0 = vcmp.eq.s32.totalorder %v304_v3, %v2254_v39  ;;  %vm476_vm1 = vcmp.eq.s32.totalorder %v304_v3, %v2260_v40 }
  0x8d   : > { %v1697_v10 = vsel %vm475_vm0, 1.0, %v2029_v43 }
  0x91   : > { %v274_v41 = vpop.permute.xlu0 %273  ;;  %388 = vperm.xlu1 %1951, %v2248_v38   ;;  %394 = vperm.xlu2 %1952, %v2248_v38  }
  0x92   : > { %vm465_vm6 = vcmp.eq.s32.totalorder %v274_v41, %v2254_v39  ;;  %vm466_vm7 = vcmp.eq.s32.totalorder %v274_v41, %v2260_v40 }
  0x93   : > { %v286_v42 = vpop.permute.xlu1 %285  ;;  %v1687_v44 = vsel %vm465_vm6, 1.0, %v2029_v43  ;;  %v1688_v45 = vsel %vm466_vm7, 1.0, %v2029_v43 }
  0x94   : > { %v657_v47 = vpack.c.bf16 %v1688_v45, %v1687_v44  ;;  %vm469_vm10 = vcmp.eq.s32.totalorder %v286_v42, %v2254_v39  ;;  %vm470_vm11 = vcmp.eq.s32.totalorder %v286_v42, %v2260_v40 }
  0x95   : > { %v1691_v59 = vsel %vm469_vm10, 1.0, %v2029_v43  ;;  %v1692_v60 = vsel %vm470_vm11, 1.0, %v2029_v43 }
  0x96   : > { %v753_v51 = vunpack.c.l.b16 %v657_v47  ;;  %v754_v53 = vunpack.c.h.b16 %v657_v47  ;;  %v659_v63 = vpack.c.bf16 %v1692_v60, %v1691_v59 }
  0x98   : > { %v757_v1 = vunpack.c.l.b16 %v659_v63  ;;  %v758_v4 = vunpack.c.h.b16 %v659_v63 }
  0x99   : > { %1953 = vset.pattern.permute.xlu1 %v2145_v11  ;;  %v1698_v11 = vsel %vm476_vm1, 1.0, %v2029_v43  ;;  %1954 = vset.pattern.permute.xlu2 %v2157_v13 }
  0x9a   : > { %v662_v14 = vpack.c.bf16 %v1698_v11, %v1697_v10 }
  0x9b   : > { %v316_v23 = vpop.permute.xlu2 %315 }
  0x9c   : > { %v763_v16 = vunpack.c.l.b16 %v662_v14  ;;  %v764_v18 = vunpack.c.h.b16 %v662_v14  ;;  %vm479_vm2 = vcmp.eq.s32.totalorder %v316_v23, %v2254_v39  ;;  %vm480_vm3 = vcmp.eq.s32.totalorder %v316_v23, %v2260_v40  ;;  %v1825_v23 = vld [vmem:[%s2673_s3 + $0x10] sm:$0xf] }
  0x9d   : > { %v1701_v13 = vsel %vm479_vm2, 1.0, %v2029_v43  ;;  %v1702_v28 = vsel %vm480_vm3, 1.0, %v2029_v43 }
  0x9e   : > { %v664_v30 = vpack.c.bf16 %v1702_v28, %v1701_v13 }
  0xa0   : > { %v767_v33 = vunpack.c.l.b16 %v664_v30  ;;  %v768_v35 = vunpack.c.h.b16 %v664_v30 }
  0xa1   : > { %v280_v46 = vpop.permute.xlu0 %279  ;;  %400 = vperm.xlu1 %1953, %v2248_v38   ;;  %406 = vperm.xlu2 %1954, %v2248_v38  }
  0xa2   : > { %vm467_vm8 = vcmp.eq.s32.totalorder %v280_v46, %v2254_v39  ;;  %vm468_vm9 = vcmp.eq.s32.totalorder %v280_v46, %v2260_v40 }
  0xa3   : > { %v1689_v48 = vsel %vm467_vm8, 1.0, %v2029_v43  ;;  %v1690_v49 = vsel %vm468_vm9, 1.0, %v2029_v43  ;;  %v292_v55 = vpop.permute.xlu1 %291 }
  0xa4   : > { %v658_v50 = vpack.c.bf16 %v1690_v49, %v1689_v48  ;;  %vm471_vm12 = vcmp.eq.s32.totalorder %v292_v55, %v2254_v39  ;;  %vm472_vm13 = vcmp.eq.s32.totalorder %v292_v55, %v2260_v40 }
  0xa5   : > { %v1693_v61 = vsel %vm471_vm12, 1.0, %v2029_v43  ;;  %v1694_v62 = vsel %vm472_vm13, 1.0, %v2029_v43 }
  0xa6   : > { %v755_v52 = vunpack.c.l.b16 %v658_v50  ;;  %v756_v54 = vunpack.c.h.b16 %v658_v50  ;;  %v660_v0 = vpack.c.bf16 %v1694_v62, %v1693_v61 }
  0xa8   : > { %v817_v56 = vpack.c.b16 %v755_v52, %v753_v51  ;;  %v818_v57 = vpack.c.b16 %v756_v54, %v754_v53  ;;  %v759_v2 = vunpack.c.l.b16 %v660_v0  ;;  %v760_v5 = vunpack.c.h.b16 %v660_v0 }
  0xa9   : > { %1956 = vset.pattern.permute.xlu1 %v2154_v12  ;;  %v661_v12 = vpack.c.bf16 %v1696_v9, %v1695_v8  ;;  %1957 = vset.pattern.permute.xlu2 %v2184_v20 }
  0xaa   : > { %985 = vmatmul.bf16.vlgmr.msra.gmra.mxu0 %v817_v56  ;;  %1074 = vmatmul.bf16.vlgmr.msra.gmra.mxu1 %v818_v57  ;;  %v819_v6 = vpack.c.b16 %v759_v2, %v757_v1  ;;  %v820_v7 = vpack.c.b16 %v760_v5, %v758_v4 }
  0xab   : > { %v761_v15 = vunpack.c.l.b16 %v661_v12  ;;  %v762_v17 = vunpack.c.h.b16 %v661_v12  ;;  %v334_v53 = vpop.permute.xlu2 %333 }
  0xac   : > { %vm485_vm10 = vcmp.eq.s32.totalorder %v334_v53, %v2254_v39  ;;  %vm486_vm11 = vcmp.eq.s32.totalorder %v334_v53, %v2260_v40 }
  0xad   : > { %v821_v25 = vpack.c.b16 %v763_v16, %v761_v15  ;;  %v822_v26 = vpack.c.b16 %v764_v18, %v762_v17  ;;  %v1708_v57 = vsel %vm486_vm11, 1.0, %v2029_v43 }
  0xb1   : > { %418 = vperm.xlu1 %1956, %v2248_v38   ;;  %424 = vperm.xlu2 %1957, %v2248_v38   ;;  %v322_v41 = vpop.permute.xlu0 %321 }
  0xb2   : > { %vm481_vm8 = vcmp.eq.s32.totalorder %v322_v41, %v2254_v39  ;;  %vm482_vm9 = vcmp.eq.s32.totalorder %v322_v41, %v2260_v40  ;;  %v1819_v41 = vld [vmem:[%s2673_s3 + $0x8] sm:$0xf0] }
  0xb3   : > { %v310_v24 = vpop.permute.xlu1 %309  ;;  %v1703_v46 = vsel %vm481_vm8, 1.0, %v2029_v43  ;;  %v1704_v47 = vsel %vm482_vm9, 1.0, %v2029_v43 }
  0xb4   : > { %vm477_vm4 = vcmp.eq.s32.totalorder %v310_v24, %v2254_v39  ;;  %vm478_vm5 = vcmp.eq.s32.totalorder %v310_v24, %v2260_v40  ;;  %v665_v48 = vpack.c.bf16 %v1704_v47, %v1703_v46  ;;  %v1888_v24 = vld [vmem:[%s2673_s3 + $0x14] sm:$0xf0] }
  0xb5   : > { %v1699_v29 = vsel %vm477_vm4, 1.0, %v2029_v43 }
  0xb6   : > { %v769_v49 = vunpack.c.l.b16 %v665_v48  ;;  %v770_v51 = vunpack.c.h.b16 %v665_v48 }
  0xb9   : > { %1958 = vset.pattern.permute.xlu1 %v2187_v21  ;;  %v1700_v21 = vsel %vm478_vm5, 1.0, %v2029_v43  ;;  %1959 = vset.pattern.permute.xlu2 %v2196_v22  ;;  %v1707_v22 = vsel %vm485_vm10, 1.0, %v2029_v43 }
  0xba   : > { %990 = vmatmul.bf16.gmra.mxu0 %v819_v6  ;;  %1079 = vmatmul.bf16.gmra.mxu1 %v820_v7  ;;  %v663_v31 = vpack.c.bf16 %v1700_v21, %v1699_v29  ;;  %v1826_v29 = vor.u32 %v1888_v24, %v1825_v23  ;;  %v1827_v21 = vld [vmem:[%s2673_s3 + $0x18] sm:$0xf0] }
  0xbb   : > { %v346_v1 = vpop.permute.xlu2 %345 }
  0xbc   : > { %v765_v32 = vunpack.c.l.b16 %v663_v31  ;;  %v766_v34 = vunpack.c.h.b16 %v663_v31  ;;  %vm489_vm14 = vcmp.eq.s32.totalorder %v346_v1, %v2254_v39  ;;  %vm490_vm15 = vcmp.eq.s32.totalorder %v346_v1, %v2260_v40  ;;  %1250 = vmatpush.bf16.msra.mxu2 %v1826_v29 }
  0xbd   : > { %v1712_v3 = vsel %vm490_vm15, 1.0, %v2029_v43 }
  0xbe   : > { %v823_v42 = vpack.c.b16 %v767_v33, %v765_v32  ;;  %v824_v44 = vpack.c.b16 %v768_v35, %v766_v34  ;;  %v1817_v33 = vld [vmem:[%s2673_s3] sm:$0xf]  ;;  %v1886_v34 = vld [vmem:[%s2673_s3 + $0x4] sm:$0xf0]  ;;  %v1885_v35 = vld [vmem:[%s2673_s3 + $0x4] sm:$0xf] }
  0xc1   : > { %430 = vperm.xlu1 %1958, %v2248_v38   ;;  %436 = vperm.xlu2 %1959, %v2248_v38   ;;  %v352_v2 = vpop.permute.xlu0 %351 }
  0xc2   : > { %vm491_vm0 = vcmp.eq.s32.totalorder %v352_v2, %v2254_v39  ;;  %vm492_vm1 = vcmp.eq.s32.totalorder %v352_v2, %v2260_v40 }
  0xc3   : > { %v328_v36 = vpop.permute.xlu1 %327  ;;  %v1714_v6 = vsel %vm492_vm1, 1.0, %v2029_v43 }
  0xc4   : > { %vm483_vm6 = vcmp.eq.s32.totalorder %v328_v36, %v2254_v39  ;;  %vm484_vm7 = vcmp.eq.s32.totalorder %v328_v36, %v2260_v40  ;;  %v1818_v36 = vor.u32 %v1886_v34, %v1817_v33 }
  0xc5   : > { %v1705_v20 = vsel %vm483_vm6, 1.0, %v2029_v43  ;;  %v1706_v45 = vsel %vm484_vm7, 1.0, %v2029_v43 }
  0xc6   : > { %1251 = vmatpush.bf16.msra.mxu2 %v1818_v36 }
  0xc9   : > { %1961 = vset.pattern.permute.xlu1 %v2181_v19  ;;  %v666_v19 = vpack.c.bf16 %v1706_v45, %v1705_v20  ;;  %1962 = vset.pattern.permute.xlu2 %v2213_v27  ;;  %v1711_v27 = vsel %vm489_vm14, 1.0, %v2029_v43  ;;  %vm1195_vm14 = vcmask 261120  }
  0xca   : > { %995 = vmatmul.bf16.gmra.mxu0 %v821_v25  ;;  %1084 = vmatmul.bf16.gmra.mxu1 %v822_v26  ;;  %v669_v7 = vpack.c.bf16 %v1712_v3, %v1711_v27  ;;  %v1887_v25 = vld [vmem:[%s2673_s3 + $0x14] sm:$0xf] }
  0xcb   : > { %v771_v50 = vunpack.c.l.b16 %v666_v19  ;;  %v772_v52 = vunpack.c.h.b16 %v666_v19  ;;  %v364_v14 = vpop.permute.xlu2 %363  ;;  %v1830_v30 = vor.u32 %v1887_v25, %v1827_v21 }
  0xcc   : > { %v777_v9 = vunpack.c.l.b16 %v669_v7  ;;  %v778_v11 = vunpack.c.h.b16 %v669_v7  ;;  %vm495_vm2 = vcmp.eq.s32.totalorder %v364_v14, %v2254_v39  ;;  %vm496_vm3 = vcmp.eq.s32.totalorder %v364_v14, %v2260_v40 }
  0xcd   : > { %v825_v55 = vpack.c.b16 %v771_v50, %v769_v49  ;;  %v826_v56 = vpack.c.b16 %v772_v52, %v770_v51  ;;  %v1717_v18 = vsel %vm495_vm2, 1.0, %v2029_v43  ;;  %v1718_v26 = vsel %vm496_vm3, 1.0, %v2029_v43  ;;  %1339 = vmatpush.bf16.msra.mxu3 %v1830_v30 }
  0xce   : > { %v672_v31 = vpack.c.bf16 %v1718_v26, %v1717_v18 }
  0xd0   : > { %v783_v20 = vunpack.c.l.b16 %v672_v31  ;;  %v784_v46 = vunpack.c.h.b16 %v672_v31 }
  0xd1   : > { %448 = vperm.xlu1 %1961, %v2248_v38   ;;  %454 = vperm.xlu2 %1962, %v2248_v38  }
  0xd3   : > { %v340_v54 = vpop.permute.xlu1 %339 }
  0xd4   : > { %vm487_vm12 = vcmp.eq.s32.totalorder %v340_v54, %v2254_v39  ;;  %vm488_vm13 = vcmp.eq.s32.totalorder %v340_v54, %v2260_v40 }
  0xd5   : > { %v1709_v58 = vsel %vm487_vm12, 1.0, %v2029_v43  ;;  %v1710_v59 = vsel %vm488_vm13, 1.0, %v2029_v43 }
  0xd6   : > { %v668_v60 = vpack.c.bf16 %v1710_v59, %v1709_v58  ;;  %v383_v59 = vpop.permute.xlu0 %382 }
  0xd7   : > { %vm501_vm10 = vcmp.eq.s32.totalorder %v383_v59, %v2254_v39  ;;  %vm502_vm11 = vcmp.eq.s32.totalorder %v383_v59, %v2260_v40 }
  0xd8   : > { %v775_v62 = vunpack.c.l.b16 %v668_v60  ;;  %v776_v0 = vunpack.c.h.b16 %v668_v60  ;;  %v1724_v1 = vsel %vm502_vm11, 1.0, %v2029_v43 }
  0xd9   : > { %1963 = vset.pattern.permute.xlu1 %v2245_v37  ;;  %v667_v37 = vpack.c.bf16 %v1708_v57, %v1707_v22 }
  0xda   : > { %1000 = vmatmul.bf16.gmra.mxu0 %v823_v42  ;;  %1089 = vmatmul.bf16.gmra.mxu1 %v824_v44  ;;  %v1822_v42 = vor.u32 %v1885_v35, %v1819_v41 }
  0xdb   : > { %v773_v61 = vunpack.c.l.b16 %v667_v37  ;;  %v774_v63 = vunpack.c.h.b16 %v667_v37  ;;  %v377_v47 = vpop.permute.xlu2 %376 }
  0xdc   : > { %1340 = vmatpush.bf16.msra.mxu3 %v1822_v42  ;;  %vm499_vm6 = vcmp.eq.s32.totalorder %v377_v47, %v2254_v39  ;;  %vm500_vm7 = vcmp.eq.s32.totalorder %v377_v47, %v2260_v40 }
  0xdd   : > { %v827_v4 = vpack.c.b16 %v775_v62, %v773_v61  ;;  %v828_v5 = vpack.c.b16 %v776_v0, %v774_v63  ;;  %v1721_v50 = vsel %vm499_vm6, 1.0, %v2029_v43  ;;  %v1722_v51 = vsel %vm500_vm7, 1.0, %v2029_v43 }
  0xde   : > { %v674_v54 = vpack.c.bf16 %v1722_v51, %v1721_v50  ;;  %v1723_v0 = vsel %vm501_vm10, 1.0, %v2029_v43 }
  0xe0   : > { %v787_v22 = vunpack.c.l.b16 %v674_v54  ;;  %v788_v58 = vunpack.c.h.b16 %v674_v54 }
  0xe1   : > { %460 = vperm.xlu1 %1963, %v2248_v38   ;;  %v1713_v38 = vsel %vm491_vm0, 1.0, %v2029_v43 }
  0xe2   : > { %v670_v8 = vpack.c.bf16 %v1714_v6, %v1713_v38 }
  0xe3   : > { %v358_v15 = vpop.permute.xlu1 %357 }
  0xe4   : > { %v779_v10 = vunpack.c.l.b16 %v670_v8  ;;  %v780_v12 = vunpack.c.h.b16 %v670_v8  ;;  %vm493_vm4 = vcmp.eq.s32.totalorder %v358_v15, %v2254_v39  ;;  %vm494_vm5 = vcmp.eq.s32.totalorder %v358_v15, %v2260_v40 }
  0xe5   : > { %v1715_v13 = vsel %vm493_vm4, 1.0, %v2029_v43  ;;  %v1716_v28 = vsel %vm494_vm5, 1.0, %v2029_v43 }
  0xe6   : > { %v829_v16 = vpack.c.b16 %v779_v10, %v777_v9  ;;  %v830_v17 = vpack.c.b16 %v780_v12, %v778_v11  ;;  %v671_v32 = vpack.c.bf16 %v1716_v28, %v1715_v13 }
  0xe8   : > { %v781_v44 = vunpack.c.l.b16 %v671_v32  ;;  %v782_v45 = vunpack.c.h.b16 %v671_v32 }
  0xea   : > { %1005 = vmatmul.bf16.gmra.mxu0 %v825_v55  ;;  %1094 = vmatmul.bf16.gmra.mxu1 %v826_v56  ;;  %v831_v48 = vpack.c.b16 %v783_v20, %v781_v44  ;;  %v832_v49 = vpack.c.b16 %v784_v46, %v782_v45  ;;  %v413_v44 = vpop.permute.xlu0 %412 }
  0xeb   : > { %v395_v14 = vpop.permute.xlu2 %394  ;;  %vm511_vm5 = vcmp.eq.s32.totalorder %v413_v44, %v2254_v39  ;;  %vm512_vm6 = vcmp.eq.s32.totalorder %v413_v44, %v2260_v40 }
  0xec   : > { %vm505_vm15 = vcmp.eq.s32.totalorder %v395_v14, %v2254_v39  ;;  %vm506_vm0 = vcmp.eq.s32.totalorder %v395_v14, %v2260_v40  ;;  %v1734_v50 = vsel %vm512_vm6, 1.0, %v2029_v43 }
  0xed   : > { %v1727_v24 = vsel %vm505_vm15, 1.0, %v2029_v43  ;;  %v1728_v25 = vsel %vm506_vm0, 1.0, %v2029_v43 }
  0xee   : > { %v677_v28 = vpack.c.bf16 %v1728_v25, %v1727_v24 }
  0xf0   : > { %v793_v33 = vunpack.c.l.b16 %v677_v28  ;;  %v794_v36 = vunpack.c.h.b16 %v677_v28 }
  0xf3   : > { %v371_v19 = vpop.permute.xlu1 %370 }
  0xf4   : > { %vm497_vm8 = vcmp.eq.s32.totalorder %v371_v19, %v2254_v39  ;;  %vm498_vm9 = vcmp.eq.s32.totalorder %v371_v19, %v2260_v40 }
  0xf5   : > { %v1719_v52 = vsel %vm497_vm8, 1.0, %v2029_v43  ;;  %v1720_v53 = vsel %vm498_vm9, 1.0, %v2029_v43 }
  0xf6   : > { %v673_v55 = vpack.c.bf16 %v1720_v53, %v1719_v52 }
  0xf8   : > { %v785_v56 = vunpack.c.l.b16 %v673_v55  ;;  %v786_v57 = vunpack.c.h.b16 %v673_v55 }
  0xfa   : > { %1010 = vmatmul.bf16.gmra.mxu0 %v827_v4  ;;  %1099 = vmatmul.bf16.gmra.mxu1 %v828_v5  ;;  %v833_v60 = vpack.c.b16 %v787_v22, %v785_v56  ;;  %v834_v61 = vpack.c.b16 %v788_v58, %v786_v57  ;;  %v675_v5 = vpack.c.bf16 %v1724_v1, %v1723_v0 }
  0xfb   : > { %v407_v42 = vpop.permute.xlu2 %406 }
  0xfc   : > { %v789_v8 = vunpack.c.l.b16 %v675_v5  ;;  %v790_v11 = vunpack.c.h.b16 %v675_v5  ;;  %vm509_vm3 = vcmp.eq.s32.totalorder %v407_v42, %v2254_v39  ;;  %vm510_vm4 = vcmp.eq.s32.totalorder %v407_v42, %v2260_v40 }
  0xfd   : > { %v1731_v19 = vsel %vm509_vm3, 1.0, %v2029_v43 }
 0x103   : > { %v389_v37 = vpop.permute.xlu1 %388 }
 0x104   : > { %vm503_vm12 = vcmp.eq.s32.totalorder %v389_v37, %v2254_v39  ;;  %vm504_vm13 = vcmp.eq.s32.totalorder %v389_v37, %v2260_v40 }
 0x105   : > { %v1725_v2 = vsel %vm503_vm12, 1.0, %v2029_v43  ;;  %v1726_v4 = vsel %vm504_vm13, 1.0, %v2029_v43 }
 0x106   : > { %v676_v27 = vpack.c.bf16 %v1726_v4, %v1725_v2 }
 0x108   : > { %v791_v10 = vunpack.c.l.b16 %v676_v27  ;;  %v792_v12 = vunpack.c.h.b16 %v676_v27 }
 0x10a   : > { %1015 = vmatmul.bf16.gmra.mxu0 %v829_v16  ;;  %1104 = vmatmul.bf16.gmra.mxu1 %v830_v17  ;;  %v835_v16 = vpack.c.b16 %v791_v10, %v789_v8  ;;  %v836_v17 = vpack.c.b16 %v792_v12, %v790_v11 }
 0x113   : > { %v401_v15 = vpop.permute.xlu1 %400 }
 0x114   : > { %vm507_vm1 = vcmp.eq.s32.totalorder %v401_v15, %v2254_v39  ;;  %vm508_vm2 = vcmp.eq.s32.totalorder %v401_v15, %v2260_v40 }
 0x115   : > { %v1729_v26 = vsel %vm507_vm1, 1.0, %v2029_v43  ;;  %v1730_v13 = vsel %vm508_vm2, 1.0, %v2029_v43 }
 0x116   : > { %v678_v29 = vpack.c.bf16 %v1730_v13, %v1729_v26 }
 0x118   : > { %v795_v35 = vunpack.c.l.b16 %v678_v29  ;;  %v796_v41 = vunpack.c.h.b16 %v678_v29 }
 0x11a   : > { %1020 = vmatmul.bf16.gmra.mxu0 %v831_v48  ;;  %1109 = vmatmul.bf16.gmra.mxu1 %v832_v49  ;;  %v837_v20 = vpack.c.b16 %v795_v35, %v793_v33  ;;  %v838_v45 = vpack.c.b16 %v796_v41, %v794_v36  ;;  %v1732_v48 = vsel %vm510_vm4, 1.0, %v2029_v43  ;;  %v1733_v49 = vsel %vm511_vm5, 1.0, %v2029_v43 }
 0x11b   : > { %v679_v51 = vpack.c.bf16 %v1732_v48, %v1731_v19  ;;  %v680_v52 = vpack.c.bf16 %v1734_v50, %v1733_v49 }
 0x11d   : > { %v797_v22 = vunpack.c.l.b16 %v679_v51  ;;  %v799_v58 = vunpack.c.l.b16 %v680_v52  ;;  %v798_v59 = vunpack.c.h.b16 %v679_v51  ;;  %v800_v37 = vunpack.c.h.b16 %v680_v52 }
 0x127   : > { %v986_v62 = vpop.f32.mrf.mxu0  ;;  %v1075_v63 = vpop.f32.mrf.mxu1 }
 0x128   : > { %v1076_v6 = vadd.f32 %v1075_v63, %v986_v62  ;;  %v839_v62 = vpack.c.b16 %v799_v58, %v797_v22  ;;  %v840_v63 = vpack.c.b16 %v800_v37, %v798_v59 }
 0x12a   : > { %1025 = vmatmul.bf16.gmra.mxu0 %v833_v60  ;;  %1114 = vmatmul.bf16.gmra.mxu1 %v834_v61  ;;  %v425_v60 = vpop.permute.xlu2 %424  ;;  %v419_v61 = vpop.permute.xlu1 %418 }
 0x12b   : > { %vm515_vm7 = vcmp.eq.s32.totalorder %v425_v60, %v2254_v39  ;;  %vm516_vm8 = vcmp.eq.s32.totalorder %v425_v60, %v2260_v40  ;;  %vm513_vm9 = vcmp.eq.s32.totalorder %v419_v61, %v2254_v39  ;;  %vm514_vm10 = vcmp.eq.s32.totalorder %v419_v61, %v2260_v40 }
 0x12c   : > { %v1737_v2 = vsel %vm515_vm7, 1.0, %v2029_v43  ;;  %v1738_v4 = vsel %vm516_vm8, 1.0, %v2029_v43  ;;  %v1735_v5 = vsel %vm513_vm9, 1.0, %v2029_v43  ;;  %v1736_v27 = vsel %vm514_vm10, 1.0, %v2029_v43 }
 0x12d   : > { %vm1427_vm8 = vcmask 1040384   ;;  %vm1429_vm9 = vcmask 1042434   ;;  %vm1431_vm10 = vcmask 1041408  }
 0x12f   : > { %v988_v3 = vpop.f32.mrf.mxu0  ;;  %v1077_v38 = vpop.f32.mrf.mxu1 }
 0x130   : > { %v1078_v7 = vadd.f32 %v1077_v38, %v988_v3  ;;  %v682_v3 = vpack.c.bf16 %v1738_v4, %v1737_v2  ;;  %v681_v38 = vpack.c.bf16 %v1736_v27, %v1735_v5 }
 0x132   : > { %v1155_v9 = vpack.c.bf16 %v1078_v7, %v1076_v6  ;;  %v803_v10 = vunpack.c.l.b16 %v682_v3  ;;  %v804_v12 = vunpack.c.h.b16 %v682_v3  ;;  %v801_v14 = vunpack.c.l.b16 %v681_v38 }
 0x133   : > { %v802_v15 = vunpack.c.h.b16 %v681_v38 }
 0x134   : > { %1831 = vmatmul.msk.bf16.vlgmr.msra.gmra.mxu2 %vm1195_vm14, %v1155_v9  ;;  %1847 = vmatmul.msk.bf16.vlgmr.msra.gmra.mxu3 %vm1195_vm14, %v1155_v9 }
 0x137   : > { %v991_v18 = vpop.f32.mrf.mxu0  ;;  %v1080_v23 = vpop.f32.mrf.mxu1 }
 0x138   : > { %v1081_v31 = vadd.f32 %v1080_v23, %v991_v18  ;;  %v841_v18 = vpack.c.b16 %v803_v10, %v801_v14  ;;  %v842_v23 = vpack.c.b16 %v804_v12, %v802_v15 }
 0x13a   : > { %1030 = vmatmul.bf16.gmra.mxu0 %v835_v16  ;;  %1119 = vmatmul.bf16.gmra.mxu1 %v836_v17  ;;  %v437_v16 = vpop.permute.xlu2 %436  ;;  %v431_v17 = vpop.permute.xlu1 %430 }
 0x13b   : > { %vm519_vm11 = vcmp.eq.s32.totalorder %v437_v16, %v2254_v39  ;;  %vm520_vm12 = vcmp.eq.s32.totalorder %v437_v16, %v2260_v40  ;;  %vm517_vm13 = vcmp.eq.s32.totalorder %v431_v17, %v2254_v39  ;;  %vm518_vm15 = vcmp.eq.s32.totalorder %v431_v17, %v2260_v40 }
 0x13c   : > { %v1741_v26 = vsel %vm519_vm11, 1.0, %v2029_v43  ;;  %v1742_v13 = vsel %vm520_vm12, 1.0, %v2029_v43  ;;  %v1739_v28 = vsel %vm517_vm13, 1.0, %v2029_v43  ;;  %v1740_v29 = vsel %vm518_vm15, 1.0, %v2029_v43 }
 0x13d   : > { %vm1433_vm11 = vcmask 1041409   ;;  %vm1435_vm12 = vcmask 1043459  }
 0x13f   : > { %v993_v21 = vpop.f32.mrf.mxu0  ;;  %v1082_v30 = vpop.f32.mrf.mxu1 }
 0x140   : > { %v1083_v32 = vadd.f32 %v1082_v30, %v993_v21  ;;  %v684_v21 = vpack.c.bf16 %v1742_v13, %v1741_v26  ;;  %v683_v30 = vpack.c.bf16 %v1740_v29, %v1739_v28 }
 0x142   : > { %v1156_v34 = vpack.c.bf16 %v1083_v32, %v1081_v31  ;;  %v807_v35 = vunpack.c.l.b16 %v684_v21  ;;  %v808_v41 = vunpack.c.h.b16 %v684_v21  ;;  %v805_v42 = vunpack.c.l.b16 %v683_v30  ;;  %v2460_v21 = vld [vmem:[%s256_s25] sm:$0xf] }
 0x143   : > { %v806_v44 = vunpack.c.h.b16 %v683_v30  ;;  %v1424_v30 = vrot.slane %v2460_v21, 1 }
 0x144   : > { %1832 = vmatmul.msk.bf16.gmra.mxu2 %vm1195_vm14, %v1156_v34  ;;  %1848 = vmatmul.msk.bf16.gmra.mxu3 %vm1195_vm14, %v1156_v34 }
 0x147   : > { %v996_v46 = vpop.f32.mrf.mxu0  ;;  %v1085_v47 = vpop.f32.mrf.mxu1 }
 0x148   : > { %v1086_v55 = vadd.f32 %v1085_v47, %v996_v46  ;;  %v843_v46 = vpack.c.b16 %v807_v35, %v805_v42  ;;  %v844_v47 = vpack.c.b16 %v808_v41, %v806_v44  ;;  %v1428_v35 = vsel %vm1427_vm8, %v2460_v21, %v1424_v30 }
 0x14a   : > { %1035 = vmatmul.bf16.gmra.mxu0 %v837_v20  ;;  %1124 = vmatmul.bf16.gmra.mxu1 %v838_v45  ;;  %v449_v20 = vpop.permute.xlu1 %448  ;;  %v443_v45 = vpop.permute.xlu0 %442 }
 0x14b   : > { %vm523_vm0 = vcmp.eq.s32.totalorder %v449_v20, %v2254_v39  ;;  %vm524_vm1 = vcmp.eq.s32.totalorder %v449_v20, %v2260_v40  ;;  %vm521_vm2 = vcmp.eq.s32.totalorder %v443_v45, %v2254_v39  ;;  %vm522_vm3 = vcmp.eq.s32.totalorder %v443_v45, %v2260_v40 }
 0x14c   : > { %v1745_v49 = vsel %vm523_vm0, 1.0, %v2029_v43  ;;  %v1746_v50 = vsel %vm524_vm1, 1.0, %v2029_v43  ;;  %v1743_v51 = vsel %vm521_vm2, 1.0, %v2029_v43  ;;  %v1744_v52 = vsel %vm522_vm3, 1.0, %v2029_v43 }
 0x14f   : > { %v998_v53 = vpop.f32.mrf.mxu0  ;;  %v1087_v54 = vpop.f32.mrf.mxu1 }
 0x150   : > { %v1088_v56 = vadd.f32 %v1087_v54, %v998_v53  ;;  %v686_v53 = vpack.c.bf16 %v1746_v50, %v1745_v49  ;;  %v685_v54 = vpack.c.bf16 %v1744_v52, %v1743_v51 }
 0x152   : > { %v1157_v57 = vpack.c.bf16 %v1088_v56, %v1086_v55  ;;  %v811_v58 = vunpack.c.l.b16 %v686_v53  ;;  %v812_v37 = vunpack.c.h.b16 %v686_v53  ;;  %v809_v60 = vunpack.c.l.b16 %v685_v54 }
 0x153   : > { %v810_v61 = vunpack.c.h.b16 %v685_v54 }
 0x154   : > { %1833 = vmatmul.msk.bf16.gmra.mxu2 %vm1195_vm14, %v1157_v57  ;;  %1849 = vmatmul.msk.bf16.gmra.mxu3 %vm1195_vm14, %v1157_v57 }
 0x157   : > { %v1001_v0 = vpop.f32.mrf.mxu0  ;;  %v1090_v1 = vpop.f32.mrf.mxu1 }
 0x158   : > { %v1091_v8 = vadd.f32 %v1090_v1, %v1001_v0  ;;  %v845_v0 = vpack.c.b16 %v811_v58, %v809_v60  ;;  %v846_v1 = vpack.c.b16 %v812_v37, %v810_v61 }
 0x15a   : > { %1040 = vmatmul.bf16.gmra.mxu0 %v839_v62  ;;  %1129 = vmatmul.bf16.gmra.mxu1 %v840_v63  ;;  %v455_v62 = vpop.permute.xlu2 %454  ;;  %v461_v63 = vpop.permute.xlu1 %460 }
 0x15b   : > { %vm525_vm4 = vcmp.eq.s32.totalorder %v455_v62, %v2254_v39  ;;  %vm526_vm5 = vcmp.eq.s32.totalorder %v455_v62, %v2260_v40  ;;  %vm527_vm6 = vcmp.eq.s32.totalorder %v461_v63, %v2254_v39  ;;  %vm528_vm7 = vcmp.eq.s32.totalorder %v461_v63, %v2260_v40 }
 0x15c   : > { %v1747_v5 = vsel %vm525_vm4, 1.0, %v2029_v43  ;;  %v1748_v27 = vsel %vm526_vm5, 1.0, %v2029_v43  ;;  %v1749_v3 = vsel %vm527_vm6, 1.0, %v2029_v43  ;;  %v1750_v38 = vsel %vm528_vm7, 1.0, %v2029_v43 }
 0x15f   : > { %v1003_v6 = vpop.f32.mrf.mxu0  ;;  %v1092_v7 = vpop.f32.mrf.mxu1 }
 0x160   : > { %v1093_v9 = vadd.f32 %v1092_v7, %v1003_v6  ;;  %v687_v6 = vpack.c.bf16 %v1748_v27, %v1747_v5  ;;  %v688_v7 = vpack.c.bf16 %v1750_v38, %v1749_v3 }
 0x162   : > { %v1158_v11 = vpack.c.bf16 %v1093_v9, %v1091_v8  ;;  %v813_v12 = vunpack.c.l.b16 %v687_v6  ;;  %v814_v40 = vunpack.c.h.b16 %v687_v6  ;;  %v815_v14 = vunpack.c.l.b16 %v688_v7 }
 0x163   : > { %v816_v15 = vunpack.c.h.b16 %v688_v7 }
 0x164   : > { %1834 = vmatmul.msk.bf16.gmra.mxu2 %vm1195_vm14, %v1158_v11  ;;  %1850 = vmatmul.msk.bf16.gmra.mxu3 %vm1195_vm14, %v1158_v11  ;;  %v847_v16 = vpack.c.b16 %v815_v14, %v813_v12 }
 0x165   : > { %v848_v17 = vpack.c.b16 %v816_v15, %v814_v40 }
 0x167   : > { %v1006_v24 = vpop.f32.mrf.mxu0  ;;  %v1095_v25 = vpop.f32.mrf.mxu1 }
 0x168   : > { %v1096_v33 = vadd.f32 %v1095_v25, %v1006_v24 }
 0x16a   : > { %1045 = vmatmul.bf16.gmra.mxu0 %v841_v18  ;;  %1134 = vmatmul.bf16.gmra.mxu1 %v842_v23 }
 0x16f   : > { %v1008_v31 = vpop.f32.mrf.mxu0  ;;  %v1097_v32 = vpop.f32.mrf.mxu1 }
 0x170   : > { %v1098_v34 = vadd.f32 %v1097_v32, %v1008_v31  ;;  %v1425_v31 = vrot.slane %v2460_v21, 2  ;;  %v1426_v32 = vrot.slane %v2460_v21, 3 }
 0x172   : > { %v1159_v36 = vpack.c.bf16 %v1098_v34, %v1096_v33 }
 0x174   : > { %1835 = vmatmul.msk.bf16.gmra.mxu2 %vm1195_vm14, %v1159_v36  ;;  %1851 = vmatmul.msk.bf16.gmra.mxu3 %vm1195_vm14, %v1159_v36  ;;  %v1430_v36 = vsel %vm1429_vm9, %v1425_v31, %v1426_v32 }
 0x175   : > { %v1432_v20 = vsel %vm1431_vm10, %v1428_v35, %v1430_v36 }
 0x176   : > { %v2477_v45 = vperm.slane %v1432_v20, 0 }
 0x177   : > { %v1011_v19 = vpop.f32.mrf.mxu0  ;;  %v1100_v48 = vpop.f32.mrf.mxu1 }
 0x178   : > { %v1101_v22 = vadd.f32 %v1100_v48, %v1011_v19 }
 0x17a   : > { %1050 = vmatmul.bf16.gmra.mxu0 %v843_v46  ;;  %1139 = vmatmul.bf16.gmra.mxu1 %v844_v47  ;;  %v2479_v46 = vperm.slane %v1432_v20, 1 }
 0x17f   : > { %v1013_v55 = vpop.f32.mrf.mxu0  ;;  %v1102_v56 = vpop.f32.mrf.mxu1 }
 0x180   : > { %v1103_v57 = vadd.f32 %v1102_v56, %v1013_v55 }
 0x182   : > { %v1160_v59 = vpack.c.bf16 %v1103_v57, %v1101_v22 }
 0x184   : > { %1836 = vmatmul.msk.bf16.gmra.mxu2 %vm1195_vm14, %v1160_v59  ;;  %1852 = vmatmul.msk.bf16.gmra.mxu3 %vm1195_vm14, %v1160_v59 }
 0x187   : > { %v1016_v2 = vpop.f32.mrf.mxu0  ;;  %v1105_v4 = vpop.f32.mrf.mxu1 }
 0x188   : > { %v1106_v10 = vadd.f32 %v1105_v4, %v1016_v2 }
 0x18a   : > { %1055 = vmatmul.bf16.gmra.mxu0 %v845_v0  ;;  %1144 = vmatmul.bf16.gmra.mxu1 %v846_v1 }
 0x18f   : > { %v1018_v8 = vpop.f32.mrf.mxu0  ;;  %v1107_v9 = vpop.f32.mrf.mxu1 }
 0x190   : > { %v1108_v11 = vadd.f32 %v1107_v9, %v1018_v8 }
 0x192   : > { %v1161_v39 = vpack.c.bf16 %v1108_v11, %v1106_v10 }
 0x194   : > { %1837 = vmatmul.msk.bf16.gmra.mxu2 %vm1195_vm14, %v1161_v39  ;;  %1853 = vmatmul.msk.bf16.gmra.mxu3 %vm1195_vm14, %v1161_v39 }
 0x197   : > { %v1021_v18 = vpop.f32.mrf.mxu0  ;;  %v1110_v43 = vpop.f32.mrf.mxu1 }
 0x198   : > { %v1111_v25 = vadd.f32 %v1110_v43, %v1021_v18 }
 0x19a   : > { %1060 = vmatmul.bf16.gmra.mxu0 %v847_v16  ;;  %1149 = vmatmul.bf16.gmra.mxu1 %v848_v17 }
 0x19f   : > { %v1023_v23 = vpop.f32.mrf.mxu0  ;;  %v1112_v24 = vpop.f32.mrf.mxu1 }
 0x1a0   : > { %v1113_v26 = vadd.f32 %v1112_v24, %v1023_v23 }
 0x1a2   : > { %v1162_v13 = vpack.c.bf16 %v1113_v26, %v1111_v25 }
 0x1a4   : > { %1838 = vmatmul.msk.bf16.gmra.mxu2 %vm1195_vm14, %v1162_v13  ;;  %1854 = vmatmul.msk.bf16.gmra.mxu3 %vm1195_vm14, %v1162_v13 }
 0x1a7   : > { %v1026_v28 = vpop.f32.mrf.mxu0  ;;  %v1115_v29 = vpop.f32.mrf.mxu1 }
 0x1a8   : > { %v1116_v41 = vadd.f32 %v1115_v29, %v1026_v28 }
 0x1af   : > { %v1028_v33 = vpop.f32.mrf.mxu0  ;;  %v1117_v34 = vpop.f32.mrf.mxu1 }
 0x1b0   : > { %v1118_v42 = vadd.f32 %v1117_v34, %v1028_v33 }
 0x1b2   : > { %v1163_v44 = vpack.c.bf16 %v1118_v42, %v1116_v41 }
 0x1b4   : > { %1839 = vmatmul.msk.bf16.gmra.mxu2 %vm1195_vm14, %v1163_v44  ;;  %1855 = vmatmul.msk.bf16.gmra.mxu3 %vm1195_vm14, %v1163_v44 }
 0x1b7   : > { %v1031_v47 = vpop.f32.mrf.mxu0  ;;  %v1120_v19 = vpop.f32.mrf.mxu1 }
 0x1b8   : > { %v1253_v48 = vpop.f32.mrf.mxu2  ;;  %v1342_v49 = vpop.f32.mrf.mxu3  ;;  %v1121_v54 = vadd.f32 %v1120_v19, %v1031_v47 }
 0x1b9   : > { %v1448_v50 = vadd.f32 %v2477_v45, %v1253_v48  ;;  %v1449_v51 = vadd.f32 %v2479_v46, %v1342_v49 }
 0x1bb   : > { %1512 = vst [vmem:[%s2483_s6] sm:$0xff] %v1448_v50 }
 0x1bc   : > { %1513 = vst [vmem:[%s2483_s6 + $0x8] sm:$0xff] %v1449_v51 }
 0x1bf   : > { %v1033_v52 = vpop.f32.mrf.mxu0  ;;  %v1122_v53 = vpop.f32.mrf.mxu1 }
 0x1c0   : > { %v1123_v55 = vadd.f32 %v1122_v53, %v1033_v52  ;;  %v1255_v56 = vpop.f32.mrf.mxu2  ;;  %v1344_v22 = vpop.f32.mrf.mxu3 }
 0x1c1   : > { %v1450_v57 = vadd.f32 %v2477_v45, %v1255_v56  ;;  %v1451_v58 = vadd.f32 %v2479_v46, %v1344_v22 }
 0x1c2   : > { %v1164_v59 = vpack.c.bf16 %v1123_v55, %v1121_v54 }
 0x1c3   : > { %1514 = vst [vmem:[%s2483_s6 + $0x10] sm:$0xff] %v1450_v57 }
 0x1c4   : > { %1515 = vst [vmem:[%s2483_s6 + $0x18] sm:$0xff] %v1451_v58  ;;  %1840 = vmatmul.msk.bf16.gmra.mxu2 %vm1195_vm14, %v1164_v59  ;;  %1856 = vmatmul.msk.bf16.gmra.mxu3 %vm1195_vm14, %v1164_v59 }
 0x1c7   : > { %v1036_v37 = vpop.f32.mrf.mxu0  ;;  %v1125_v60 = vpop.f32.mrf.mxu1 }
 0x1c8   : > { %v1258_v61 = vpop.f32.mrf.mxu2  ;;  %v1347_v62 = vpop.f32.mrf.mxu3  ;;  %v1126_v4 = vadd.f32 %v1125_v60, %v1036_v37 }
 0x1c9   : > { %v1452_v63 = vadd.f32 %v2477_v45, %v1258_v61  ;;  %v1453_v0 = vadd.f32 %v2479_v46, %v1347_v62 }
 0x1cb   : > { %1516 = vst [vmem:[%s2483_s6 + $0x20] sm:$0xff] %v1452_v63 }
 0x1cc   : > { %1517 = vst [vmem:[%s2483_s6 + $0x28] sm:$0xff] %v1453_v0 }
 0x1cf   : > { %v1038_v1 = vpop.f32.mrf.mxu0  ;;  %v1127_v2 = vpop.f32.mrf.mxu1 }
 0x1d0   : > { %v1128_v5 = vadd.f32 %v1127_v2, %v1038_v1  ;;  %v1260_v27 = vpop.f32.mrf.mxu2  ;;  %v1349_v3 = vpop.f32.mrf.mxu3 }
 0x1d1   : > { %v1454_v38 = vadd.f32 %v2477_v45, %v1260_v27  ;;  %v1455_v6 = vadd.f32 %v2479_v46, %v1349_v3 }
 0x1d2   : > { %v1165_v7 = vpack.c.bf16 %v1128_v5, %v1126_v4 }
 0x1d3   : > { %1518 = vst [vmem:[%s2483_s6 + $0x30] sm:$0xff] %v1454_v38 }
 0x1d4   : > { %1519 = vst [vmem:[%s2483_s6 + $0x38] sm:$0xff] %v1455_v6  ;;  %1841 = vmatmul.msk.bf16.gmra.mxu2 %vm1195_vm14, %v1165_v7  ;;  %1857 = vmatmul.msk.bf16.gmra.mxu3 %vm1195_vm14, %v1165_v7 }
 0x1d7   : > { %v1041_v8 = vpop.f32.mrf.mxu0  ;;  %v1130_v9 = vpop.f32.mrf.mxu1 }
 0x1d8   : > { %v1263_v10 = vpop.f32.mrf.mxu2  ;;  %v1352_v11 = vpop.f32.mrf.mxu3  ;;  %v1131_v15 = vadd.f32 %v1130_v9, %v1041_v8 }
 0x1d9   : > { %v1456_v12 = vadd.f32 %v2477_v45, %v1263_v10  ;;  %v1457_v39 = vadd.f32 %v2479_v46, %v1352_v11 }
 0x1db   : > { %1520 = vst [vmem:[%s2483_s6 + $0x40] sm:$0xff] %v1456_v12 }
 0x1dc   : > { %1521 = vst [vmem:[%s2483_s6 + $0x48] sm:$0xff] %v1457_v39 }
 0x1df   : > { %v1043_v40 = vpop.f32.mrf.mxu0  ;;  %v1132_v14 = vpop.f32.mrf.mxu1 }
 0x1e0   : > { %v1133_v16 = vadd.f32 %v1132_v14, %v1043_v40  ;;  %v1265_v17 = vpop.f32.mrf.mxu2  ;;  %v1354_v18 = vpop.f32.mrf.mxu3 }
 0x1e1   : > { %v1458_v43 = vadd.f32 %v2477_v45, %v1265_v17  ;;  %v1459_v23 = vadd.f32 %v2479_v46, %v1354_v18 }
 0x1e2   : > { %v1166_v24 = vpack.c.bf16 %v1133_v16, %v1131_v15 }
 0x1e3   : > { %1522 = vst [vmem:[%s2483_s6 + $0x50] sm:$0xff] %v1458_v43 }
 0x1e4   : > { %1523 = vst [vmem:[%s2483_s6 + $0x58] sm:$0xff] %v1459_v23  ;;  %1842 = vmatmul.msk.bf16.gmra.mxu2 %vm1195_vm14, %v1166_v24  ;;  %1858 = vmatmul.msk.bf16.gmra.mxu3 %vm1195_vm14, %v1166_v24 }
 0x1e7   : > { %v1046_v25 = vpop.f32.mrf.mxu0  ;;  %v1135_v26 = vpop.f32.mrf.mxu1 }
 0x1e8   : > { %v1268_v13 = vpop.f32.mrf.mxu2  ;;  %v1357_v28 = vpop.f32.mrf.mxu3  ;;  %v1136_v36 = vadd.f32 %v1135_v26, %v1046_v25 }
 0x1e9   : > { %v1460_v29 = vadd.f32 %v2477_v45, %v1268_v13  ;;  %v1461_v33 = vadd.f32 %v2479_v46, %v1357_v28 }
 0x1eb   : > { %1524 = vst [vmem:[%s2483_s6 + $0x60] sm:$0xff] %v1460_v29 }
 0x1ec   : > { %1525 = vst [vmem:[%s2483_s6 + $0x68] sm:$0xff] %v1461_v33 }
 0x1ef   : > { %v1048_v34 = vpop.f32.mrf.mxu0  ;;  %v1137_v35 = vpop.f32.mrf.mxu1 }
 0x1f0   : > { %v1138_v41 = vadd.f32 %v1137_v35, %v1048_v34  ;;  %v1270_v42 = vpop.f32.mrf.mxu2  ;;  %v1359_v44 = vpop.f32.mrf.mxu3  ;;  %v1434_v34 = vsel %vm1433_vm11, %v2460_v21, %v1424_v30  ;;  %v1436_v35 = vsel %vm1435_vm12, %v1425_v31, %v1426_v32 }
 0x1f1   : > { %v1462_v20 = vadd.f32 %v2477_v45, %v1270_v42  ;;  %v1463_v47 = vadd.f32 %v2479_v46, %v1359_v44 }
 0x1f2   : > { %v1167_v19 = vpack.c.bf16 %v1138_v41, %v1136_v36 }
 0x1f3   : > { %1526 = vst [vmem:[%s2483_s6 + $0x70] sm:$0xff] %v1462_v20 }
 0x1f4   : > { %1527 = vst [vmem:[%s2483_s6 + $0x78] sm:$0xff] %v1463_v47  ;;  %1843 = vmatmul.msk.bf16.gmra.mxu2 %vm1195_vm14, %v1167_v19  ;;  %1859 = vmatmul.msk.bf16.gmra.mxu3 %vm1195_vm14, %v1167_v19 }
 0x1f7   : > { %v1051_v48 = vpop.f32.mrf.mxu0  ;;  %v1140_v49 = vpop.f32.mrf.mxu1 }
 0x1f8   : > { %v1273_v50 = vpop.f32.mrf.mxu2  ;;  %v1362_v51 = vpop.f32.mrf.mxu3  ;;  %v1141_v56 = vadd.f32 %v1140_v49, %v1051_v48 }
 0x1f9   : > { %v1464_v52 = vadd.f32 %v2477_v45, %v1273_v50  ;;  %v1465_v53 = vadd.f32 %v2479_v46, %v1362_v51 }
 0x1fb   : > { %1528 = vst [vmem:[%s2483_s6 + $0x80] sm:$0xff] %v1464_v52 }
 0x1fc   : > { %1529 = vst [vmem:[%s2483_s6 + $0x88] sm:$0xff] %v1465_v53 }
 0x1ff   : > { %v1053_v54 = vpop.f32.mrf.mxu0  ;;  %v1142_v55 = vpop.f32.mrf.mxu1 }
 0x200   : > { %v1143_v22 = vadd.f32 %v1142_v55, %v1053_v54  ;;  %v1275_v57 = vpop.f32.mrf.mxu2  ;;  %v1364_v58 = vpop.f32.mrf.mxu3 }
 0x201   : > { %v1466_v59 = vadd.f32 %v2477_v45, %v1275_v57  ;;  %v1467_v37 = vadd.f32 %v2479_v46, %v1364_v58 }
 0x202   : > { %v1168_v60 = vpack.c.bf16 %v1143_v22, %v1141_v56 }
 0x203   : > { %1530 = vst [vmem:[%s2483_s6 + $0x90] sm:$0xff] %v1466_v59 }
 0x204   : > { %1531 = vst [vmem:[%s2483_s6 + $0x98] sm:$0xff] %v1467_v37  ;;  %1844 = vmatmul.msk.bf16.gmra.mxu2 %vm1195_vm14, %v1168_v60  ;;  %1860 = vmatmul.msk.bf16.gmra.mxu3 %vm1195_vm14, %v1168_v60 }
 0x207   : > { %v1056_v61 = vpop.f32.mrf.mxu0  ;;  %v1145_v62 = vpop.f32.mrf.mxu1 }
 0x208   : > { %v1278_v63 = vpop.f32.mrf.mxu2  ;;  %v1367_v0 = vpop.f32.mrf.mxu3  ;;  %v1146_v27 = vadd.f32 %v1145_v62, %v1056_v61 }
 0x209   : > { %v1468_v1 = vadd.f32 %v2477_v45, %v1278_v63  ;;  %v1469_v2 = vadd.f32 %v2479_v46, %v1367_v0 }
 0x20b   : > { %1532 = vst [vmem:[%s2483_s6 + $0xa0] sm:$0xff] %v1468_v1 }
 0x20c   : > { %1533 = vst [vmem:[%s2483_s6 + $0xa8] sm:$0xff] %v1469_v2 }
 0x20f   : > { %v1058_v4 = vpop.f32.mrf.mxu0  ;;  %v1147_v5 = vpop.f32.mrf.mxu1 }
 0x210   : > { %v1148_v3 = vadd.f32 %v1147_v5, %v1058_v4  ;;  %v1280_v38 = vpop.f32.mrf.mxu2  ;;  %v1369_v6 = vpop.f32.mrf.mxu3 }
 0x211   : > { %v1470_v7 = vadd.f32 %v2477_v45, %v1280_v38  ;;  %v1471_v8 = vadd.f32 %v2479_v46, %v1369_v6 }
 0x212   : > { %v1169_v9 = vpack.c.bf16 %v1148_v3, %v1146_v27 }
 0x213   : > { %1534 = vst [vmem:[%s2483_s6 + $0xb0] sm:$0xff] %v1470_v7 }
 0x214   : > { %1535 = vst [vmem:[%s2483_s6 + $0xb8] sm:$0xff] %v1471_v8  ;;  %1845 = vmatmul.msk.bf16.gmra.mxu2 %vm1195_vm14, %v1169_v9  ;;  %1861 = vmatmul.msk.bf16.gmra.mxu3 %vm1195_vm14, %v1169_v9 }
 0x217   : > { %v1061_v10 = vpop.f32.mrf.mxu0  ;;  %v1150_v11 = vpop.f32.mrf.mxu1 }
 0x218   : > { %v1283_v12 = vpop.f32.mrf.mxu2  ;;  %v1372_v39 = vpop.f32.mrf.mxu3  ;;  %v1151_v17 = vadd.f32 %v1150_v11, %v1061_v10 }
 0x219   : > { %v1472_v40 = vadd.f32 %v2477_v45, %v1283_v12  ;;  %v1473_v14 = vadd.f32 %v2479_v46, %v1372_v39 }
 0x21b   : > { %1536 = vst [vmem:[%s2483_s6 + $0xc0] sm:$0xff] %v1472_v40 }
 0x21c   : > { %1537 = vst [vmem:[%s2483_s6 + $0xc8] sm:$0xff] %v1473_v14 }
 0x21f   : > { %v1063_v15 = vpop.f32.mrf.mxu0  ;;  %v1152_v16 = vpop.f32.mrf.mxu1 }
 0x220   : > { %v1153_v18 = vadd.f32 %v1152_v16, %v1063_v15  ;;  %v1285_v43 = vpop.f32.mrf.mxu2  ;;  %v1374_v23 = vpop.f32.mrf.mxu3 }
 0x221   : > { %v1474_v24 = vadd.f32 %v2477_v45, %v1285_v43  ;;  %v1475_v25 = vadd.f32 %v2479_v46, %v1374_v23 }
 0x222   : > { %v1170_v26 = vpack.c.bf16 %v1153_v18, %v1151_v17 }
 0x223   : > { %1538 = vst [vmem:[%s2483_s6 + $0xd0] sm:$0xff] %v1474_v24 }
 0x224   : > { %1539 = vst [vmem:[%s2483_s6 + $0xd8] sm:$0xff] %v1475_v25  ;;  %1846 = vmatmul.msk.bf16.gmra.mxu2 %vm1195_vm14, %v1170_v26  ;;  %1862 = vmatmul.msk.bf16.gmra.mxu3 %vm1195_vm14, %v1170_v26  ;;  %vm1437_vm14 = vcmask 1042433  }
 0x225   : > { %v1438_v36 = vsel %vm1437_vm14, %v1434_v34, %v1436_v35 }
 0x226   : > { %v1439_v47 = vrot.slane %v1438_v36, 1 }
 0x228   : > { %v1288_v13 = vpop.f32.mrf.mxu2  ;;  %v1377_v28 = vpop.f32.mrf.mxu3  ;;  %v2568_v30 = vperm.slane %v1439_v47, 0  ;;  %v2570_v21 = vperm.slane %v1439_v47, 1 }
 0x229   : > { %v1476_v29 = vadd.f32 %v2477_v45, %v1288_v13  ;;  %v1477_v33 = vadd.f32 %v2479_v46, %v1377_v28 }
 0x22b   : > { %1540 = vst [vmem:[%s2483_s6 + $0xe0] sm:$0xff] %v1476_v29 }
 0x22c   : > { %1541 = vst [vmem:[%s2483_s6 + $0xe8] sm:$0xff] %v1477_v33 }
 0x230   : > { %v1290_v41 = vpop.f32.mrf.mxu2  ;;  %v1379_v42 = vpop.f32.mrf.mxu3 }
 0x231   : > { %v1478_v44 = vadd.f32 %v2477_v45, %v1290_v41  ;;  %v1479_v20 = vadd.f32 %v2479_v46, %v1379_v42 }
 0x233   : > { %1542 = vst [vmem:[%s2483_s6 + $0xf0] sm:$0xff] %v1478_v44 }
 0x234   : > { %1543 = vst [vmem:[%s2483_s6 + $0xf8] sm:$0xff] %v1479_v20 }
 0x238   : > { %v1293_v31 = vpop.f32.mrf.mxu2  ;;  %v1382_v32 = vpop.f32.mrf.mxu3 }
 0x239   : > { %v1480_v19 = vadd.f32 %v2568_v30, %v1293_v31  ;;  %v1481_v48 = vadd.f32 %v2570_v21, %v1382_v32 }
 0x23b   : > { %1544 = vst [vmem:[%s2483_s6 + $0x100] sm:$0xff] %v1480_v19 }
 0x23c   : > { %1545 = vst [vmem:[%s2483_s6 + $0x108] sm:$0xff] %v1481_v48 }
 0x240   : > { %v1295_v45 = vpop.f32.mrf.mxu2  ;;  %v1384_v46 = vpop.f32.mrf.mxu3 }
 0x241   : > { %v1482_v49 = vadd.f32 %v2568_v30, %v1295_v45  ;;  %v1483_v50 = vadd.f32 %v2570_v21, %v1384_v46 }
 0x243   : > { %1546 = vst [vmem:[%s2483_s6 + $0x110] sm:$0xff] %v1482_v49 }
 0x244   : > { %1547 = vst [vmem:[%s2483_s6 + $0x118] sm:$0xff] %v1483_v50 }
 0x248   : > { %v1298_v51 = vpop.f32.mrf.mxu2  ;;  %v1387_v52 = vpop.f32.mrf.mxu3 }
 0x249   : > { %v1484_v53 = vadd.f32 %v2568_v30, %v1298_v51  ;;  %v1485_v54 = vadd.f32 %v2570_v21, %v1387_v52 }
 0x24b   : > { %1548 = vst [vmem:[%s2483_s6 + $0x120] sm:$0xff] %v1484_v53 }
 0x24c   : > { %1549 = vst [vmem:[%s2483_s6 + $0x128] sm:$0xff] %v1485_v54 }
 0x250   : > { %v1300_v55 = vpop.f32.mrf.mxu2  ;;  %v1389_v56 = vpop.f32.mrf.mxu3 }
 0x251   : > { %v1486_v22 = vadd.f32 %v2568_v30, %v1300_v55  ;;  %v1487_v57 = vadd.f32 %v2570_v21, %v1389_v56 }
 0x253   : > { %1550 = vst [vmem:[%s2483_s6 + $0x130] sm:$0xff] %v1486_v22 }
 0x254   : > { %1551 = vst [vmem:[%s2483_s6 + $0x138] sm:$0xff] %v1487_v57 }
 0x258   : > { %v1303_v58 = vpop.f32.mrf.mxu2  ;;  %v1392_v59 = vpop.f32.mrf.mxu3 }
 0x259   : > { %v1488_v37 = vadd.f32 %v2568_v30, %v1303_v58  ;;  %v1489_v60 = vadd.f32 %v2570_v21, %v1392_v59 }
 0x25b   : > { %1552 = vst [vmem:[%s2483_s6 + $0x140] sm:$0xff] %v1488_v37 }
 0x25c   : > { %1553 = vst [vmem:[%s2483_s6 + $0x148] sm:$0xff] %v1489_v60 }
 0x260   : > { %v1305_v61 = vpop.f32.mrf.mxu2  ;;  %v1394_v62 = vpop.f32.mrf.mxu3 }
 0x261   : > { %v1490_v63 = vadd.f32 %v2568_v30, %v1305_v61  ;;  %v1491_v0 = vadd.f32 %v2570_v21, %v1394_v62 }
 0x263   : > { %1554 = vst [vmem:[%s2483_s6 + $0x150] sm:$0xff] %v1490_v63 }
 0x264   : > { %1555 = vst [vmem:[%s2483_s6 + $0x158] sm:$0xff] %v1491_v0 }
 0x268   : > { %v1308_v1 = vpop.f32.mrf.mxu2  ;;  %v1397_v2 = vpop.f32.mrf.mxu3 }
 0x269   : > { %v1492_v4 = vadd.f32 %v2568_v30, %v1308_v1  ;;  %v1493_v5 = vadd.f32 %v2570_v21, %v1397_v2 }
 0x26b   : > { %1556 = vst [vmem:[%s2483_s6 + $0x160] sm:$0xff] %v1492_v4 }
 0x26c   : > { %1557 = vst [vmem:[%s2483_s6 + $0x168] sm:$0xff] %v1493_v5 }
 0x270   : > { %v1310_v27 = vpop.f32.mrf.mxu2  ;;  %v1399_v3 = vpop.f32.mrf.mxu3 }
 0x271   : > { %v1494_v38 = vadd.f32 %v2568_v30, %v1310_v27  ;;  %v1495_v6 = vadd.f32 %v2570_v21, %v1399_v3 }
 0x273   : > { %1558 = vst [vmem:[%s2483_s6 + $0x170] sm:$0xff] %v1494_v38 }
 0x274   : > { %1559 = vst [vmem:[%s2483_s6 + $0x178] sm:$0xff] %v1495_v6 }
 0x278   : > { %v1313_v7 = vpop.f32.mrf.mxu2  ;;  %v1402_v8 = vpop.f32.mrf.mxu3 }
 0x279   : > { %v1496_v9 = vadd.f32 %v2568_v30, %v1313_v7  ;;  %v1497_v10 = vadd.f32 %v2570_v21, %v1402_v8 }
 0x27b   : > { %1560 = vst [vmem:[%s2483_s6 + $0x180] sm:$0xff] %v1496_v9 }
 0x27c   : > { %1561 = vst [vmem:[%s2483_s6 + $0x188] sm:$0xff] %v1497_v10 }
 0x280   : > { %v1315_v11 = vpop.f32.mrf.mxu2  ;;  %v1404_v12 = vpop.f32.mrf.mxu3 }
 0x281   : > { %v1498_v39 = vadd.f32 %v2568_v30, %v1315_v11  ;;  %v1499_v40 = vadd.f32 %v2570_v21, %v1404_v12 }
 0x283   : > { %1562 = vst [vmem:[%s2483_s6 + $0x190] sm:$0xff] %v1498_v39 }
 0x284   : > { %1563 = vst [vmem:[%s2483_s6 + $0x198] sm:$0xff] %v1499_v40 }
 0x288   : > { %v1318_v14 = vpop.f32.mrf.mxu2  ;;  %v1407_v15 = vpop.f32.mrf.mxu3 }
 0x289   : > { %v1500_v16 = vadd.f32 %v2568_v30, %v1318_v14  ;;  %v1501_v17 = vadd.f32 %v2570_v21, %v1407_v15 }
 0x28b   : > { %1564 = vst [vmem:[%s2483_s6 + $0x1a0] sm:$0xff] %v1500_v16 }
 0x28c   : > { %1565 = vst [vmem:[%s2483_s6 + $0x1a8] sm:$0xff] %v1501_v17 }
 0x290   : > { %v1320_v18 = vpop.f32.mrf.mxu2  ;;  %v1409_v43 = vpop.f32.mrf.mxu3 }
 0x291   : > { %v1502_v23 = vadd.f32 %v2568_v30, %v1320_v18  ;;  %v1503_v24 = vadd.f32 %v2570_v21, %v1409_v43 }
 0x293   : > { %1566 = vst [vmem:[%s2483_s6 + $0x1b0] sm:$0xff] %v1502_v23 }
 0x294   : > { %1567 = vst [vmem:[%s2483_s6 + $0x1b8] sm:$0xff] %v1503_v24 }
 0x298   : > { %v1323_v25 = vpop.f32.mrf.mxu2  ;;  %v1412_v26 = vpop.f32.mrf.mxu3 }
 0x299   : > { %v1504_v13 = vadd.f32 %v2568_v30, %v1323_v25  ;;  %v1505_v28 = vadd.f32 %v2570_v21, %v1412_v26 }
 0x29b   : > { %1568 = vst [vmem:[%s2483_s6 + $0x1c0] sm:$0xff] %v1504_v13 }
 0x29c   : > { %1569 = vst [vmem:[%s2483_s6 + $0x1c8] sm:$0xff] %v1505_v28 }
 0x2a0   : > { %v1325_v29 = vpop.f32.mrf.mxu2  ;;  %v1414_v33 = vpop.f32.mrf.mxu3 }
 0x2a1   : > { %v1506_v34 = vadd.f32 %v2568_v30, %v1325_v29  ;;  %v1507_v35 = vadd.f32 %v2570_v21, %v1414_v33 }
 0x2a3   : > { %1570 = vst [vmem:[%s2483_s6 + $0x1d0] sm:$0xff] %v1506_v34 }
 0x2a4   : > { %1571 = vst [vmem:[%s2483_s6 + $0x1d8] sm:$0xff] %v1507_v35 }
 0x2a8   : > { %v1328_v36 = vpop.f32.mrf.mxu2  ;;  %v1417_v41 = vpop.f32.mrf.mxu3 }
 0x2a9   : > { %v1508_v42 = vadd.f32 %v2568_v30, %v1328_v36  ;;  %v1509_v44 = vadd.f32 %v2570_v21, %v1417_v41 }
 0x2ab   : > { %1572 = vst [vmem:[%s2483_s6 + $0x1e0] sm:$0xff] %v1508_v42 }
 0x2ac   : > { %1573 = vst [vmem:[%s2483_s6 + $0x1e8] sm:$0xff] %v1509_v44 }
 0x2b0   : > { %v1330_v20 = vpop.f32.mrf.mxu2  ;;  %v1419_v47 = vpop.f32.mrf.mxu3 }
 0x2b1   : > { %v1510_v31 = vadd.f32 %v2568_v30, %v1330_v20  ;;  %v1511_v32 = vadd.f32 %v2570_v21, %v1419_v47 }
 0x2b3   : > { %1574 = vst [vmem:[%s2483_s6 + $0x1f0] sm:$0xff] %v1510_v31 }
 0x2b4   : > { %1575 = vst [vmem:[%s2483_s6 + $0x1f8] sm:$0xff] %v1511_v32 }
 0x2b5   : > { %1992 = shalt.err (!%p1989_p3)
}
 0x2b6   : > { %s2030_s30 = smov 256   ;;  %s2031_s26 = smov 16  }
 0x2b7   : > { %1890 = dma.vmem_to_hbm [thread:$0]  (%p2100_p5), %s1590_s11, 8192, %s1592_s12, %s1577_s22, %s2030_s30, %s2030_s30, %s2031_s26  }
 0x2b8 PF: > { %p1896_p4 = scmp.ge.s32.totalorder %s2027_s21, 2  ;;  %s1606_s6 = sand.u32 1, %s2015_s18  }
 0x2b9   : > { %s1607_s7 = scalar_lea.sflag [#allocation3], %s1606_s6 }
 0x2ba   : > { %p1893_p7 = pnand %p1896_p4, %p2104_p6 }
 0x2bc   : > { %p1894_p8 = pneg %p1893_p7 }
 0x2be   : > { %2010 = dma.done.wait (%p1894_p8), %s1607_s7, 8192  }
 0x2bf   : > { %2012 = vsyncadd (%p1894_p8), %s1607_s7, 4294959104  ;;  %p15_p9 = scmp.ge.s32.totalorder %s2087_s24, 6   ;;  %s2678_s18 = smov %s2019_s19 }
 0x2c0   : > { %s2679_s19 = smov %s2023_s20  ;;  %s2680_s20 = smov %s2098_s27 }
 0x2c1   : > { %s2681_s21 = smov %s2087_s24  ;;  %17 = sbr.rel (!%p15_p9) target bundleno = 3 (0x3), region = 81 }
 0x2c6   :  { %1613 = vsyncpa [#allocation3], 1 }
 0x2c7   :  { %1615 = vsyncpa [#allocation3 + $0x1], 1 }

</bundles_post_ra>
